<compile_context>
chip_gen: v6e
topology: v6e:2x2x1
jax: 0.10.0
libtpu: 0.0.40
codegen_flags: <defaults>
</compile_context>

<pallas_src>
import jax
import jax.numpy as jnp
from jax import lax
from jax.experimental import pallas as pl
from jax.experimental.pallas import tpu as pltpu


def _logreg_kernel(x_ref, m_ref, o_ref):
    # x_ref: (tm, D) f32 batch tile (streamed).
    # m_ref: (tn, D) bf16 weight block (fully resident when tn == N).
    # o_ref: (tm, tn) output tile (lane-dense, tn a multiple of 128).
    x = x_ref[...].astype(jnp.bfloat16)          # free on the VPU; keep x reads f32 in HBM
    z = lax.dot_general(                          # x @ m.T on the MXU, f32 accumulation
        x, m_ref[...],
        dimension_numbers=(((1,), (1,)), ((), ())),
        preferred_element_type=jnp.float32,
    )
    # sigmoid = 1 / (1 + exp(-z)): exp + approx reciprocal both run on the EUP
    # slot, keeping the epilogue off the VALU / store critical path.
    o_ref[...] = pl.reciprocal(1.0 + jnp.exp(-z), approx=True).astype(o_ref.dtype)


def _round_up(v, mult):
    return ((v + mult - 1) // mult) * mult


def _round_tm(t, B):
    """Round a batch tile to B (full), a multiple of 128, or a multiple of 16."""
    if t >= B:
        return B
    if t >= 128:
        return (t // 128) * 128
    return max(16, (t // 16) * 16)


def _vmem_capacity_bytes(default=64 * 1024 * 1024):
    try:
        info = pltpu.get_tpu_info()
        cap = getattr(info, "vmem_capacity_bytes", None)
        if cap:
            return int(cap)
    except Exception:
        pass
    return default  # conservative (v7x-sized) fallback


def logistic_regression_forward(x, m, q=None, *, sample=False, key=None,
                                tm_max=1024, out_dtype=None,
                                vmem_budget_bytes=None):
    """sigmoid(x @ m.T), optionally with posterior-sampled weights.

    x: (B, n_dim+1) float32, m: (n_items, n_dim+1) float32,
    q: (n_items, n_dim+1) precision (only used when sample=True).
    Returns (B, n_items) in `out_dtype` (default: x.dtype; pass jnp.bfloat16 to
    halve output HBM traffic if downstream tolerates it).
    """
    B, D = x.shape
    N, D2 = m.shape
    assert D == D2
    out_dtype = jnp.dtype(out_dtype) if out_dtype is not None else x.dtype

    if sample:
        # Posterior sampling path: per-weight Gaussian noise, std = 1/sqrt(q),
        # added in f32 in the wrapper (one tiny elementwise op on (N, D)).
        if key is None:
            raise ValueError("sample=True requires a PRNG `key`")
        qv = q if q is not None else jnp.ones_like(m)
        m = m + jax.random.normal(key, m.shape, dtype=m.dtype) / jnp.sqrt(qv)

    # One-time cast (no transpose): halves W HBM read + VMEM residency.
    m_lowp = m.astype(jnp.bfloat16)

    # Pad n_items to a lane multiple so output stores are unmasked/lane-dense.
    N_pad = _round_up(N, 128)
    if N_pad != N:
        m_lowp = jnp.pad(m_lowp, ((0, N_pad - N), (0, 0)))

    x_bytes = x.dtype.itemsize
    out_bytes = out_dtype.itemsize

    # Generation-aware VMEM budget (~96 MiB on 128-MiB v5e/v6e, ~48 MiB on
    # 64-MiB-per-TC v7x); leave headroom for Mosaic internal scratch.
    vmem_cap = _vmem_capacity_bytes()
    if vmem_budget_bytes is None:
        vmem_budget_bytes = int(vmem_cap * 0.75)

    def footprint(t_m, t_n, w_bufs):
        return (2 * t_m * D * x_bytes        # x tile, double-buffered
                + w_bufs * t_n * D * 2       # bf16 weights
                + 2 * t_m * t_n * out_bytes)  # output tile, double-buffered

    # --- batch tile selection ---------------------------------------------
    tm = min(tm_max, B)
    # >= ~4 grid steps over batch when B is large: keeps both v7x TensorCores
    # busy (parallel axis) and preserves input/output pipelining.
    tm = min(tm, _round_up(pl.cdiv(B, 4), 128))
    tm = _round_tm(tm, B)

    tn = N_pad
    w_bufs = 1  # resident weights -> single buffer (pl.Buffered(1))
    while tm > 16 and footprint(tm, tn, w_bufs) > vmem_budget_bytes:
        tm = _round_tm(tm // 2, B)

    # --- N-tiling fallback (only if bf16 W alone blows the budget) ---------
    if footprint(tm, tn, w_bufs) > vmem_budget_bytes and N_pad > 128:
        w_bufs = 2  # W now streams per n_items tile -> default double buffer
        while tn > 128 and footprint(tm, tn, w_bufs) > vmem_budget_bytes:
            tn = max(128, _round_up(tn // 2, 128))

    ni = pl.cdiv(B, tm)
    nj = pl.cdiv(N_pad, tn)

    if nj == 1:
        # Constant index_map: hold W resident, no second buffer.
        w_spec = pl.BlockSpec((tn, D), lambda i, j: (0, 0),
                              pipeline_mode=pl.Buffered(1))
    else:
        w_spec = pl.BlockSpec((tn, D), lambda i, j: (j, 0))

    final_fp = footprint(tm, tn, w_bufs)
    vmem_limit = min(vmem_cap, max(32 * 1024 * 1024, final_fp + 16 * 1024 * 1024))

    cost = pl.CostEstimate(
        flops=2 * B * D * N_pad,
        transcendentals=B * N_pad,
        bytes_accessed=B * D * x_bytes + N_pad * D * 2 + B * N_pad * out_bytes,
    )

    out = pl.pallas_call(
        _logreg_kernel,
        out_shape=jax.ShapeDtypeStruct((B, N_pad), out_dtype),
        grid_spec=pl.GridSpec(
            grid=(ni, nj),
            in_specs=[
                pl.BlockSpec((tm, D), lambda i, j: (i, 0)),  # stream batch tiles
                w_spec,                                       # weights
            ],
            out_specs=pl.BlockSpec((tm, tn), lambda i, j: (i, j)),
        ),
        compiler_params=pltpu.CompilerParams(
            dimension_semantics=("parallel", "parallel"),
            vmem_limit_bytes=vmem_limit,
        ),
        cost_estimate=cost,
    )(x, m_lowp)

    if N_pad != N:
        out = out[:, :N]
    return out


if __name__ == "__main__":
    # Module shapes: n_dim features (+1 bias column baked into m), n_items rows.
    n_dim = 127            # n_dim + 1 = 128 -> lane-aligned feature dim
    n_items = 256
    batch = 64

    key = jax.random.PRNGKey(0)
    k_x, k_m, k_s = jax.random.split(key, 3)

    # Deterministic init: m ~ Normal(0, 1), shape (n_items, n_dim+1)
    m = jax.random.normal(k_m, (n_items, n_dim + 1), dtype=jnp.float32)
    x = jax.random.normal(k_x, (batch, n_dim + 1), dtype=jnp.float32)

    # MAP / eval path (sample=False)
    out = logistic_regression_forward(x, m)
    out = jax.block_until_ready(out)
    assert out.shape == (batch, n_items)

    # Check against the same bf16-input / f32-accumulate math the kernel runs
    # (tolerance allows the EUP approx-reciprocal sigmoid).
    ref_bf16 = jax.nn.sigmoid(
        lax.dot_general(x.astype(jnp.bfloat16), m.astype(jnp.bfloat16),
                        dimension_numbers=(((1,), (1,)), ((), ())),
                        preferred_element_type=jnp.float32))
    assert jnp.allclose(out, ref_bf16, atol=2e-3, rtol=2e-3)

    # Loose check against the full-f32 reference torch.sigmoid(F.linear(x, m));
    # tolerance accounts for the bf16 MXU inputs.
    ref_f32 = jax.nn.sigmoid(x @ m.T)
    assert jnp.allclose(out, ref_f32, atol=5e-2)

    # Posterior-sampling path (sample=True): same kernel, noisy weights.
    q = jnp.ones((n_items, n_dim + 1), dtype=jnp.float32)
    out_s = logistic_regression_forward(x, m, q, sample=True, key=k_s)
    out_s = jax.block_until_ready(out_s)
    assert out_s.shape == (batch, n_items)
    assert bool(jnp.all((out_s >= 0.0) & (out_s <= 1.0)))

    print("KERNEL_OK")
</pallas_src>

<mosaic_0001>
module attributes {stable_mosaic.version = 11 : i64} {
  func.func @_logreg_kernel(%arg0: i32, %arg1: i32, %arg2: memref<64x128xf32, #tpu.memory_space<vmem>>, %arg3: memref<256x128xbf16, #tpu.memory_space<vmem>>, %arg4: memref<64x256xf32, #tpu.memory_space<vmem>>) attributes {dimension_semantics = [#tpu.dimension_semantics<parallel>, #tpu.dimension_semantics<parallel>], iteration_bounds = array<i64: 1, 1>, scalar_prefetch = 0 : i64, scratch_operands = 0 : i64, tpu.core_type = #tpu.core_type<tc>, window_params = [{transform_indices = @transform_0, window_bounds = array<i64: 64, 128>}, {pipeline_mode = #tpu.pipeline_mode<synchronous>, transform_indices = @transform_1, window_bounds = array<i64: 256, 128>}, {transform_indices = @transform_2, window_bounds = array<i64: 64, 256>}]} {
    %c0 = arith.constant 0 : index
    %c0_0 = arith.constant 0 : index
    %0 = vector.load %arg2[%c0, %c0_0] : memref<64x128xf32, #tpu.memory_space<vmem>>, vector<64x128xf32>
    %1 = arith.truncf %0 : vector<64x128xf32> to vector<64x128xbf16>
    %c0_1 = arith.constant 0 : index
    %c0_2 = arith.constant 0 : index
    %2 = vector.load %arg3[%c0_1, %c0_2] : memref<256x128xbf16, #tpu.memory_space<vmem>>, vector<256x128xbf16>
    %cst = arith.constant dense<0.000000e+00> : vector<64x256xf32>
    %3 = tpu.matmul %1, %2, %cst {dimension_numbers = #tpu.dot_dimension_numbers<[1], [1], [0], [0], [0, 0, 1, 0], [], []>} : vector<64x128xbf16>, vector<256x128xbf16>, vector<64x256xf32> -> vector<64x256xf32>
    %cst_3 = arith.constant 0.000000e+00 : f32
    %4 = vector.broadcast %cst_3 : f32 to vector<64x256xf32>
    %5 = arith.subf %4, %3 : vector<64x256xf32>
    %6 = math.exp %5 : vector<64x256xf32>
    %cst_4 = arith.constant 1.000000e+00 : f32
    %7 = vector.broadcast %cst_4 : f32 to vector<64x256xf32>
    %8 = arith.addf %7, %6 : vector<64x256xf32>
    %9 = tpu.reciprocal %8 {approx = true} : vector<64x256xf32> -> vector<64x256xf32>
    %c0_5 = arith.constant 0 : index
    %c0_6 = arith.constant 0 : index
    %10 = vector.load %arg4[%c0_5, %c0_6] : memref<64x256xf32, #tpu.memory_space<vmem>>, vector<64x256xf32>
    tpu.vector_store %arg4[%c0_5, %c0_6], %9 {strides = array<i32>} : memref<64x256xf32, #tpu.memory_space<vmem>>, vector<64x256xf32>,
    return
  }
  func.func @transform_0(%arg0: i32, %arg1: i32) -> (i32, i32) {
    %c0_i32 = arith.constant 0 : i32
    %c0_i32_0 = arith.constant 0 : i32
    return %arg0, %c0_i32 : i32, i32
  }
  func.func @transform_1(%arg0: i32, %arg1: i32) -> (i32, i32) {
    %c0_i32 = arith.constant 0 : i32
    %c0_i32_0 = arith.constant 0 : i32
    %c0_i32_1 = arith.constant 0 : i32
    return %c0_i32, %c0_i32_0 : i32, i32
  }
  func.func @transform_2(%arg0: i32, %arg1: i32) -> (i32, i32) {
    %c0_i32 = arith.constant 0 : i32
    return %arg0, %arg1 : i32, i32
  }
}

</mosaic_0001>

<bundles_post_ra>
// kernel: tpu_custom_call.1
= control target key start
LH: loop header
LB: loop body
LE: loop exit
PB: predicated region body
PF: predicated region fallthrough
CT: control target
= control target key end

     0   :  { %7 = vsyncpa [#allocation3], 0  ;;  %s612_s0 = inlined_call_operand.hbm [shape: f32[64,128], index: 0, kind: input, shape index: {}]   ;;  %s613_s1 = inlined_call_operand.hbm [shape: bf16[256,128], index: 1, kind: input, shape index: {}]   ;;  %s614_s2 = inlined_call_operand.hbm [shape: f32[64,256], index: 2, kind: output, shape index: {}]  }
   0x1   :  { %8 = vsyncpa [#allocation6], 0 }
   0x2   :  { %9 = vsyncpa [#allocation4], 0  ;;  %s579_s9 = smov [#allocation2]  }
   0x3   :  { %s15_s10 = sshll.u32 %s579_s9, 4  ;;  %s16_s10 = int_to_ptr.vmem [resolvable:$true] %s15_s10 }
   0x4   :  { %s521_s11 = scalar_lea.vmem %s16_s10, 1024  ;;  %p526_p1 = scmp.lt.s32.totalorder %s16_s10, %s16_s10 }
   0x5   :  { %p522_p0 = scmp.ne.s32.totalorder %s16_s10, %s521_s11  ;;  %p527_p2 = scmp.lt.s32.totalorder %s521_s11, %s521_s11 }
   0x7   :  { %p528_p3 = por %p527_p2, %p526_p1 }
   0x9   :  { %p529_p4 = pnand %p528_p3, %p522_p0 }
   0xb   :  { %532 = shalt.err (!%p529_p4)
}
   0xc   :  { %s580_s12 = smov 128   ;;  %s581_s13 = smov 8  }
   0xd   :  { %21 = dma.hbm_to_vmem [thread:$0]  %s612_s0, 1024, %s16_s10, [#allocation3], %s580_s12, %s580_s12, %s581_s13  }
   0xe   :  { %s582_s16 = smov [#allocation5]  }
   0xf   :  { %s27_s17 = sshll.u32 %s582_s16, 4  ;;  %s28_s17 = int_to_ptr.vmem [resolvable:$true] %s27_s17 }
  0x10   :  { %s541_s18 = scalar_lea.vmem %s28_s17, 2048  ;;  %p546_p6 = scmp.lt.s32.totalorder %s28_s17, %s28_s17 }
  0x11   :  { %p542_p5 = scmp.ne.s32.totalorder %s28_s17, %s541_s18  ;;  %p547_p7 = scmp.lt.s32.totalorder %s541_s18, %s541_s18 }
  0x13   :  { %p548_p8 = por %p547_p7, %p546_p6 }
  0x15   :  { %p549_p9 = pnand %p548_p8, %p542_p5 }
  0x17   :  { %552 = shalt.err (!%p549_p9)
}
  0x18   :  { %s583_s19 = smov 64   ;;  %s584_s20 = smov 4  }
  0x19   :  { %33 = dma.hbm_to_vmem [thread:$0]  %s613_s1, 2048, %s28_s17, [#allocation6], %s583_s19, %s583_s19, %s584_s20  }
  0x1a   :  { %573 = dma.done.wait [#allocation3], 1024  }
  0x1b   :  { %574 = vsyncadd [#allocation3], 4294966272 }
  0x1c   :  { %575 = dma.done.wait [#allocation6], 2048  }
  0x1d   :  { %576 = vsyncadd [#allocation6], 4294965248  ;;  %v433_v0 = vld [vmem:[#allocation5 + $0x78] sm:$0xff]   ;;  %v435_v2 = vld [vmem:[#allocation5 + $0x70] sm:$0xff]   ;;  %s585_s0 = smov [#allocation7]  }
  0x1e   :  { %v434_v1 = vld [vmem:[#allocation5 + $0x38] sm:$0xff]   ;;  %384 = vmatprep.subr.bf16.mxu0 %v433_v0  ;;  %408 = vmatprep.subr.bf16.mxu1 %v433_v0  ;;  %v436_v3 = vld [vmem:[#allocation5 + $0x30] sm:$0xff]   ;;  %v437_v4 = vld [vmem:[#allocation5 + $0x68] sm:$0xff]   ;;  %s355_s1 = sshll.u32 %s585_s0, 4  ;;  %s356_s1 = int_to_ptr.vmem [resolvable:$true] %s355_s1 }
  0x1f   :  { %385 = vmatpush3.bf16.xpose.msra.mxu0 %v434_v1  ;;  %416 = vmatpush3.bf16.xpose.msra.mxu1 %v434_v1  ;;  %v438_v5 = vld [vmem:[#allocation5 + $0x28] sm:$0xff]   ;;  %v439_v6 = vld [vmem:[#allocation5 + $0x60] sm:$0xff]   ;;  %v441_v14 = vld [vmem:[#allocation5 + $0x58] sm:$0xff]   ;;  %s553_s23 = scalar_lea.vmem %s356_s1, 2048  ;;  %p558_p11 = scmp.lt.s32.totalorder %s356_s1, %s356_s1 }
  0x20   :  { %386 = vmatprep.subr.bf16.mxu0 %v435_v2  ;;  %409 = vmatprep.subr.bf16.mxu1 %v435_v2  ;;  %v41_v7 = vld [vmem:[#allocation2] sm:$0xff]  ;;  %v42_v8 = vld [vmem:[#allocation2 + $0x8] sm:$0xff]  ;;  %v442_v15 = vld [vmem:[#allocation5 + $0x18] sm:$0xff]   ;;  %p554_p10 = scmp.ne.s32.totalorder %s356_s1, %s553_s23  ;;  %p559_p12 = scmp.lt.s32.totalorder %s553_s23, %s553_s23 }
  0x21   :  { %v45_v9 = vld [vmem:[#allocation2 + $0x20] sm:$0xff]  ;;  %v49_v10 = vpack.c.bf16 %v42_v8, %v41_v7  ;;  %v46_v11 = vld [vmem:[#allocation2 + $0x28] sm:$0xff]  ;;  %v443_v16 = vld [vmem:[#allocation5 + $0x50] sm:$0xff]  }
  0x22   :  { %v51_v12 = vpack.c.bf16 %v46_v11, %v45_v9  ;;  %v440_v13 = vld [vmem:[#allocation5 + $0x20] sm:$0xff]   ;;  %v444_v17 = vld [vmem:[#allocation5 + $0x10] sm:$0xff]   ;;  %v445_v18 = vld [vmem:[#allocation5 + $0x48] sm:$0xff]   ;;  %p560_p13 = por %p559_p12, %p558_p11 }
  0x23   :  { %400 = vmatprep.mubr.bf16.mxu0 %v49_v10  ;;  %v446_v19 = vld [vmem:[#allocation5 + $0x8] sm:$0xff]   ;;  %v447_v20 = vld [vmem:[#allocation5 + $0x40] sm:$0xff]   ;;  %v43_v22 = vld [vmem:[#allocation2 + $0x10] sm:$0xff] }
  0x24   :  { %404 = vmatprep.mubr.bf16.mxu1 %v51_v12  ;;  %v448_v21 = vld [vmem:[#allocation5] sm:$0xff]   ;;  %v44_v23 = vld [vmem:[#allocation2 + $0x18] sm:$0xff]  ;;  %v47_v24 = vld [vmem:[#allocation2 + $0x30] sm:$0xff]  ;;  %p561_p0 = pnand %p560_p13, %p554_p10 }
  0x25   :  { %v48_v25 = vld [vmem:[#allocation2 + $0x38] sm:$0xff]  ;;  %v50_v26 = vpack.c.bf16 %v44_v23, %v43_v22 }
  0x26   :  { %v52_v27 = vpack.c.bf16 %v48_v25, %v47_v24 }
  0x27   :  { %387 = vmatpush3.bf16.xpose.msra.mxu0 %v436_v3  ;;  %417 = vmatpush3.bf16.xpose.msra.mxu1 %v436_v3 }
  0x28   :  { %388 = vmatprep.subr.bf16.mxu0 %v437_v4  ;;  %410 = vmatprep.subr.bf16.mxu1 %v437_v4 }
  0x2f   :  { %389 = vmatpush3.bf16.xpose.msra.mxu0 %v438_v5  ;;  %418 = vmatpush3.bf16.xpose.msra.mxu1 %v438_v5 }
  0x30   :  { %390 = vmatprep.subr.bf16.mxu0 %v439_v6  ;;  %411 = vmatprep.subr.bf16.mxu1 %v439_v6 }
  0x37   :  { %391 = vmatpush3.bf16.xpose.msra.mxu0 %v440_v13  ;;  %419 = vmatpush3.bf16.xpose.msra.mxu1 %v440_v13 }
  0x38   :  { %392 = vmatprep.subr.bf16.mxu0 %v441_v14  ;;  %412 = vmatprep.subr.bf16.mxu1 %v441_v14 }
  0x3f   :  { %393 = vmatpush3.bf16.xpose.msra.mxu0 %v442_v15  ;;  %420 = vmatpush3.bf16.xpose.msra.mxu1 %v442_v15 }
  0x40   :  { %394 = vmatprep.subr.bf16.mxu0 %v443_v16  ;;  %413 = vmatprep.subr.bf16.mxu1 %v443_v16 }
  0x47   :  { %395 = vmatpush3.bf16.xpose.msra.mxu0 %v444_v17  ;;  %421 = vmatpush3.bf16.xpose.msra.mxu1 %v444_v17 }
  0x48   :  { %396 = vmatprep.subr.bf16.mxu0 %v445_v18  ;;  %414 = vmatprep.subr.bf16.mxu1 %v445_v18 }
  0x4f   :  { %397 = vmatpush3.bf16.xpose.msra.mxu0 %v446_v19  ;;  %422 = vmatpush3.bf16.xpose.msra.mxu1 %v446_v19 }
  0x50   :  { %398 = vmatprep.subr.bf16.mxu0 %v447_v20  ;;  %415 = vmatprep.subr.bf16.mxu1 %v447_v20 }
  0x57   :  { %399 = vmatpush3.bf16.xpose.msra.mxu0 %v448_v21  ;;  %423 = vmatpush3.bf16.xpose.msra.mxu1 %v448_v21 }
  0x5e   :  { %401 = vmatmul.mubr.bf16.vlgmr.msra.gmra.mxu0 %v49_v10  ;;  %405 = vmatmul.mubr.bf16.vlgmr.msra.gmra.mxu1 %v51_v12 }
  0x5f   :  { %402 = vmatprep.mubr.bf16.mxu0 %v50_v26  ;;  %406 = vmatprep.mubr.bf16.mxu1 %v52_v27 }
  0x66   :  { %403 = vmatmul.mubr.bf16.gmra.mxu0 %v50_v26  ;;  %407 = vmatmul.mubr.bf16.gmra.mxu1 %v52_v27 }
 0x11e   :  { %v215_v28 = vpop.f32.mrf.mxu0  ;;  %v235_v29 = vpop.f32.mrf.mxu1 }
 0x11f   :  { %v254_v30 = vsub.f32 0.0, %v215_v28  ;;  %v262_v31 = vsub.f32 0.0, %v235_v29 }
 0x120   :  { %v217_v32 = vpop.f32.mrf.mxu0  ;;  %v237_v33 = vpop.f32.mrf.mxu1 }
 0x121   :  { %v270_v34 = vmul.f32 1.442695, %v254_v30  ;;  %v286_v35 = vmul.f32 1.442695, %v262_v31  ;;  %v255_v36 = vsub.f32 0.0, %v217_v32  ;;  %v263_v37 = vsub.f32 0.0, %v237_v33 }
 0x122   :  { %v219_v38 = vpop.f32.mrf.mxu0  ;;  %v239_v39 = vpop.f32.mrf.mxu1 }
 0x123   :  { %449 = vpow2.f32 %v270_v34  ;;  %v272_v40 = vmul.f32 1.442695, %v255_v36  ;;  %v288_v41 = vmul.f32 1.442695, %v263_v37  ;;  %v256_v42 = vsub.f32 0.0, %v219_v38 }
 0x124   :  { %451 = vpow2.f32 %v286_v35  ;;  %v264_v43 = vsub.f32 0.0, %v239_v39  ;;  %v221_v44 = vpop.f32.mrf.mxu0  ;;  %v241_v45 = vpop.f32.mrf.mxu1 }
 0x125   :  { %453 = vpow2.f32 %v272_v40  ;;  %v274_v46 = vmul.f32 1.442695, %v256_v42  ;;  %v257_v47 = vsub.f32 0.0, %v221_v44  ;;  %v265_v48 = vsub.f32 0.0, %v241_v45 }
 0x126   :  { %455 = vpow2.f32 %v288_v41  ;;  %v290_v49 = vmul.f32 1.442695, %v264_v43  ;;  %v225_v50 = vpop.f32.mrf.mxu0  ;;  %v245_v51 = vpop.f32.mrf.mxu1 }
 0x127   :  { %457 = vpow2.f32 %v274_v46  ;;  %v276_v52 = vmul.f32 1.442695, %v257_v47  ;;  %v292_v53 = vmul.f32 1.442695, %v265_v48  ;;  %v258_v54 = vsub.f32 0.0, %v225_v50 }
 0x128   :  { %459 = vpow2.f32 %v290_v49  ;;  %v266_v55 = vsub.f32 0.0, %v245_v51  ;;  %v227_v56 = vpop.f32.mrf.mxu0  ;;  %v247_v57 = vpop.f32.mrf.mxu1 }
 0x129   :  { %461 = vpow2.f32 %v276_v52  ;;  %v278_v58 = vmul.f32 1.442695, %v258_v54  ;;  %v259_v59 = vsub.f32 0.0, %v227_v56  ;;  %v267_v60 = vsub.f32 0.0, %v247_v57 }
 0x12a   :  { %463 = vpow2.f32 %v292_v53  ;;  %v294_v61 = vmul.f32 1.442695, %v266_v55  ;;  %v229_v62 = vpop.f32.mrf.mxu0  ;;  %v249_v63 = vpop.f32.mrf.mxu1 }
 0x12b   :  { %465 = vpow2.f32 %v278_v58  ;;  %v280_v0 = vmul.f32 1.442695, %v259_v59  ;;  %v296_v1 = vmul.f32 1.442695, %v267_v60  ;;  %v260_v2 = vsub.f32 0.0, %v229_v62 }
 0x12c   :  { %467 = vpow2.f32 %v294_v61  ;;  %v268_v3 = vsub.f32 0.0, %v249_v63  ;;  %v231_v4 = vpop.f32.mrf.mxu0  ;;  %v251_v5 = vpop.f32.mrf.mxu1 }
 0x12d   :  { %469 = vpow2.f32 %v280_v0  ;;  %v282_v6 = vmul.f32 1.442695, %v260_v2  ;;  %v261_v7 = vsub.f32 0.0, %v231_v4  ;;  %v269_v8 = vsub.f32 0.0, %v251_v5 }
 0x12e   :  { %471 = vpow2.f32 %v296_v1  ;;  %v298_v9 = vmul.f32 1.442695, %v268_v3 }
 0x12f   :  { %473 = vpow2.f32 %v282_v6  ;;  %v284_v10 = vmul.f32 1.442695, %v261_v7  ;;  %v300_v11 = vmul.f32 1.442695, %v269_v8 }
 0x130   :  { %v450_v12 = vpop.eup %449  ;;  %475 = vpow2.f32 %v298_v9 }
 0x131   :  { %v452_v13 = vpop.eup %451  ;;  %v302_v14 = vadd.f32 1.0, %v450_v12  ;;  %477 = vpow2.f32 %v284_v10 }
 0x132   :  { %v454_v15 = vpop.eup %453  ;;  %v310_v16 = vadd.f32 1.0, %v452_v13  ;;  %479 = vpow2.f32 %v300_v11 }
 0x133   :  { %v456_v17 = vpop.eup %455  ;;  %481 = vrcp.f32 %v302_v14  ;;  %v303_v18 = vadd.f32 1.0, %v454_v15 }
 0x134   :  { %v458_v19 = vpop.eup %457  ;;  %483 = vrcp.f32 %v310_v16  ;;  %v311_v20 = vadd.f32 1.0, %v456_v17 }
 0x135   :  { %v460_v21 = vpop.eup %459  ;;  %485 = vrcp.f32 %v303_v18  ;;  %v304_v22 = vadd.f32 1.0, %v458_v19 }
 0x136   :  { %v462_v23 = vpop.eup %461  ;;  %487 = vrcp.f32 %v311_v20  ;;  %v312_v24 = vadd.f32 1.0, %v460_v21 }
 0x137   :  { %v464_v25 = vpop.eup %463  ;;  %489 = vrcp.f32 %v304_v22  ;;  %v305_v26 = vadd.f32 1.0, %v462_v23 }
 0x138   :  { %v466_v27 = vpop.eup %465  ;;  %491 = vrcp.f32 %v312_v24  ;;  %v313_v28 = vadd.f32 1.0, %v464_v25 }
 0x139   :  { %v468_v29 = vpop.eup %467  ;;  %493 = vrcp.f32 %v305_v26  ;;  %v306_v30 = vadd.f32 1.0, %v466_v27 }
 0x13a   :  { %v470_v31 = vpop.eup %469  ;;  %495 = vrcp.f32 %v313_v28  ;;  %v314_v32 = vadd.f32 1.0, %v468_v29 }
 0x13b   :  { %v472_v33 = vpop.eup %471  ;;  %497 = vrcp.f32 %v306_v30  ;;  %v307_v34 = vadd.f32 1.0, %v470_v31 }
 0x13c   :  { %v474_v35 = vpop.eup %473  ;;  %499 = vrcp.f32 %v314_v32  ;;  %v315_v36 = vadd.f32 1.0, %v472_v33 }
 0x13d   :  { %v476_v37 = vpop.eup %475  ;;  %501 = vrcp.f32 %v307_v34  ;;  %v308_v38 = vadd.f32 1.0, %v474_v35 }
 0x13e   :  { %v478_v39 = vpop.eup %477  ;;  %503 = vrcp.f32 %v315_v36  ;;  %v316_v40 = vadd.f32 1.0, %v476_v37 }
 0x13f   :  { %v480_v41 = vpop.eup %479  ;;  %505 = vrcp.f32 %v308_v38  ;;  %v309_v42 = vadd.f32 1.0, %v478_v39 }
 0x140   :  { %v482_v43 = vpop.eup %481  ;;  %507 = vrcp.f32 %v316_v40  ;;  %v317_v44 = vadd.f32 1.0, %v480_v41 }
 0x141   :  { %v484_v45 = vpop.eup %483  ;;  %334 = vst [vmem:[#allocation7] sm:$0xff] %v482_v43  ;;  %509 = vrcp.f32 %v309_v42 }
 0x142   :  { %v486_v46 = vpop.eup %485  ;;  %342 = vst [vmem:[#allocation7 + $0x40] sm:$0xff] %v484_v45  ;;  %511 = vrcp.f32 %v317_v44 }
 0x143   :  { %v488_v47 = vpop.eup %487  ;;  %335 = vst [vmem:[#allocation7 + $0x8] sm:$0xff] %v486_v46 }
 0x144   :  { %v490_v48 = vpop.eup %489  ;;  %343 = vst [vmem:[#allocation7 + $0x48] sm:$0xff] %v488_v47 }
 0x145   :  { %v492_v49 = vpop.eup %491  ;;  %336 = vst [vmem:[#allocation7 + $0x10] sm:$0xff] %v490_v48 }
 0x146   :  { %v494_v50 = vpop.eup %493  ;;  %344 = vst [vmem:[#allocation7 + $0x50] sm:$0xff] %v492_v49 }
 0x147   :  { %v496_v51 = vpop.eup %495  ;;  %337 = vst [vmem:[#allocation7 + $0x18] sm:$0xff] %v494_v50 }
 0x148   :  { %v498_v52 = vpop.eup %497  ;;  %345 = vst [vmem:[#allocation7 + $0x58] sm:$0xff] %v496_v51 }
 0x149   :  { %v500_v53 = vpop.eup %499  ;;  %338 = vst [vmem:[#allocation7 + $0x20] sm:$0xff] %v498_v52 }
 0x14a   :  { %v502_v54 = vpop.eup %501  ;;  %346 = vst [vmem:[#allocation7 + $0x60] sm:$0xff] %v500_v53 }
 0x14b   :  { %v504_v55 = vpop.eup %503  ;;  %339 = vst [vmem:[#allocation7 + $0x28] sm:$0xff] %v502_v54 }
 0x14c   :  { %v506_v56 = vpop.eup %505  ;;  %347 = vst [vmem:[#allocation7 + $0x68] sm:$0xff] %v504_v55 }
 0x14d   :  { %v508_v57 = vpop.eup %507  ;;  %340 = vst [vmem:[#allocation7 + $0x30] sm:$0xff] %v506_v56 }
 0x14e   :  { %v510_v58 = vpop.eup %509  ;;  %348 = vst [vmem:[#allocation7 + $0x70] sm:$0xff] %v508_v57 }
 0x14f   :  { %v512_v59 = vpop.eup %511  ;;  %341 = vst [vmem:[#allocation7 + $0x38] sm:$0xff] %v510_v58 }
 0x150   :  { %349 = vst [vmem:[#allocation7 + $0x78] sm:$0xff] %v512_v59 }
 0x151   :  { %564 = shalt.err (!%p561_p0)
}
 0x152   :  { %s586_s24 = smov 256   ;;  %s587_s25 = smov 16  }
 0x153   :  { %361 = dma.vmem_to_hbm [thread:$0]  %s356_s1, 2048, %s614_s2, [#allocation4], %s586_s24, %s586_s24, %s587_s25  }
 0x154   :  { %577 = dma.done.wait [#allocation4], 2048  }
 0x155   :  { %578 = vsyncadd [#allocation4], 4294965248 }
 0x156   :  { %365 = vsyncpa [#allocation3], 1 }
 0x157   :  { %366 = vsyncpa [#allocation6], 1 }
 0x158   :  { %367 = vsyncpa [#allocation4], 1 }

</bundles_post_ra>
